<compile_context>
chip_gen: v5e
topology: v5e:2x2
jax: 0.10.0
libtpu: 0.0.40
codegen_flags: <defaults>
</compile_context>

<pallas_src>
import functools

import jax
import jax.numpy as jnp
from jax.experimental import pallas as pl
from jax.experimental.pallas import tpu as pltpu


def _round_up(a, b):
    return (a + b - 1) // b * b


_NEG_INF = -1e30   # finite "minus infinity" bias for padded class columns


def _tpu_tuning():
    """Generation-aware tile / VMEM knobs (safe defaults if unknown)."""
    try:
        kind = jax.devices()[0].device_kind.lower()
    except Exception:
        kind = ""
    if "v7" in kind:
        # keep >= 2 row tiles so both TensorCores get work; stay under 64 MiB VMEM
        return dict(tr_max=512, tk=2048, vmem_cap=56 << 20, two_tiles=True)
    if "v6" in kind:
        return dict(tr_max=512, tk=2048, vmem_cap=96 << 20, two_tiles=False)
    if "v5 lite" in kind or "v5e" in kind or "v5lite" in kind:
        return dict(tr_max=256, tk=1024, vmem_cap=96 << 20, two_tiles=False)
    return dict(tr_max=256, tk=1024, vmem_cap=48 << 20, two_tiles=False)


# ----------------------------------------------------------------------------
# Pallas kernel: fused fc6 -> ReLU -> fc7 -> ReLU -> predictor -> softmax
# Grid: (ROI-row tiles [parallel], D-reduction tiles [arbitrary]).
# fc6 accumulates over D into an f32 VMEM scratch; the remaining MLP + softmax
# run once per row tile, on the last reduction step.
# ----------------------------------------------------------------------------
def relation_head_kernel(x_ref, w6_ref, b6_ref, w7_ref, b7_ref, wp_ref, bp_ref,
                         feat_ref, probs_ref, acc_ref):
    k = pl.program_id(1)

    @pl.when(k == 0)
    def _():
        acc_ref[...] = jnp.zeros_like(acc_ref)

    # fc6 partial product: bf16 operands, f32 accumulation on the MXU.
    acc_ref[...] += jnp.dot(x_ref[...], w6_ref[...],
                            preferred_element_type=jnp.float32)

    @pl.when(k == pl.num_programs(1) - 1)
    def _():
        # fc6 bias + ReLU
        h6 = jnp.maximum(acc_ref[...] + b6_ref[...], 0.0)             # [TR, Hp]
        # fc7 + ReLU  == feature-extractor output `x`
        h7 = jnp.dot(h6.astype(w7_ref.dtype), w7_ref[...],
                     preferred_element_type=jnp.float32) + b7_ref[...]
        h7 = jnp.maximum(h7, 0.0)
        feat_ref[...] = h7.astype(feat_ref.dtype)
        # predictor (relation logits stay in-register) + softmax post-processor
        logits = jnp.dot(h7.astype(wp_ref.dtype), wp_ref[...],
                         preferred_element_type=jnp.float32) + bp_ref[...]
        m = jnp.max(logits, axis=-1, keepdims=True)
        e = jnp.exp(logits - m)
        denom = jnp.sum(e, axis=-1, keepdims=True)
        probs_ref[...] = (e / denom).astype(probs_ref.dtype)   # exact division


def relation_head_mlp(x_bf16, params, dims, tune):
    """x_bf16: [R, D] bf16 (un-padded). params: pre-padded, pre-cast weights.
    Returns (features [R, H] f32, probs [R, K] f32)."""
    R, D = x_bf16.shape
    H, K = dims["H"], dims["K"]
    D_pad, Hp, Kp, TK = dims["D_pad"], dims["Hp"], dims["Kp"], dims["TK"]

    # Row-tile selection (generation aware).
    R_pad8 = _round_up(R, 8)
    if tune["two_tiles"] and R_pad8 >= 16:
        TR = min(tune["tr_max"], _round_up((R_pad8 + 1) // 2, 8))
    else:
        TR = min(tune["tr_max"], R_pad8)
    R_pad = _round_up(R_pad8, TR)

    # bf16 zero pad of the activations only (weights were padded in __init__).
    x_p = jnp.pad(x_bf16, ((0, R_pad - R), (0, D_pad - D)))

    grid = (R_pad // TR, D_pad // TK)
    n_row_tiles = grid[0]

    f32 = jnp.float32

    # Rough VMEM budget: double-buffered inputs/outputs + f32 accumulator.
    in_bytes = (TR * TK * 2 + TK * Hp * 2 + Hp * 4 + Hp * Hp * 2 + Hp * 4
                + Hp * Kp * 2 + Kp * 4)
    out_bytes = TR * Hp * 4 + TR * Kp * 4
    vmem_limit = int(min(max(2 * (in_bytes + out_bytes) + TR * Hp * 4
                             + (4 << 20), 16 << 20), tune["vmem_cap"]))

    cost = pl.CostEstimate(
        flops=2 * R_pad * (D_pad * Hp + Hp * Hp + Hp * Kp),
        transcendentals=R_pad * Kp,
        bytes_accessed=(R_pad * D_pad * 2                      # activations
                        + n_row_tiles * D_pad * Hp * 2         # w6, once per row tile
                        + Hp * Hp * 2 + Hp * Kp * 2
                        + (2 * Hp + Kp) * 4
                        + R_pad * Hp * 4 + R_pad * Kp * 4),
    )

    feat_p, probs_p = pl.pallas_call(
        relation_head_kernel,
        out_shape=(
            jax.ShapeDtypeStruct((R_pad, Hp), f32),   # feature-extractor x
            jax.ShapeDtypeStruct((R_pad, Kp), f32),   # softmax(relation_logits)
        ),
        grid_spec=pltpu.PrefetchScalarGridSpec(
            num_scalar_prefetch=0,
            grid=grid,
            in_specs=[
                pl.BlockSpec((TR, TK), lambda i, k: (i, k)),   # x
                pl.BlockSpec((TK, Hp), lambda i, k: (k, 0)),   # w6
                pl.BlockSpec((1, Hp), lambda i, k: (0, 0)),    # b6
                pl.BlockSpec((Hp, Hp), lambda i, k: (0, 0)),   # w7 (VMEM-resident)
                pl.BlockSpec((1, Hp), lambda i, k: (0, 0)),    # b7
                pl.BlockSpec((Hp, Kp), lambda i, k: (0, 0)),   # wp (VMEM-resident)
                pl.BlockSpec((1, Kp), lambda i, k: (0, 0)),    # bp
            ],
            out_specs=[
                pl.BlockSpec((TR, Hp), lambda i, k: (i, 0)),
                pl.BlockSpec((TR, Kp), lambda i, k: (i, 0)),
            ],
            scratch_shapes=[pltpu.VMEM((TR, Hp), f32)],
        ),
        compiler_params=pltpu.CompilerParams(
            dimension_semantics=("parallel", "arbitrary"),
            vmem_limit_bytes=vmem_limit),
        cost_estimate=cost,
    )(x_p, params["w6"], params["b6"], params["w7"], params["b7"],
      params["wp"], params["bp"])

    return feat_p[:R, :H], probs_p[:R, :K]


# ----------------------------------------------------------------------------
# ROIAlign pooler (plain-JAX glue, gather-based): per sample point only the
# 2x2 bilinear neighbourhood is gathered from a channels-last bf16 copy of the
# feature map, so the cost scales with R * 7*7*sr^2 * C instead of the full
# feature-map area per ROI.
# ----------------------------------------------------------------------------
# TODO(synk): fuse the pooler into the Pallas kernel via scalar-prefetched
# sample indices + manual make_async_copy (paged-attention style).
def roi_align(features, boxes, box_batch_idx, out_size=7,
              spatial_scale=0.25, sampling_ratio=2):
    """features: [N, C, Hf, Wf] (NCHW); boxes: [R, 4] (x1,y1,x2,y2) in image
    coords; box_batch_idx: [R] int32. Returns [R, C, out_size, out_size] f32."""
    N, C, Hf, Wf = features.shape
    sr = sampling_ratio          # TODO(synk): adaptive ceil(roi/out) when cfg sets <=0
    S = out_size * sr
    R = boxes.shape[0]

    # channels-last bf16 copy: contiguous per-point gathers, half the HBM read.
    feats = jnp.transpose(features, (0, 2, 3, 1)).astype(jnp.bfloat16)

    scaled = boxes.astype(jnp.float32) * spatial_scale
    x1, y1, x2, y2 = scaled[:, 0], scaled[:, 1], scaled[:, 2], scaled[:, 3]
    roi_w = jnp.maximum(x2 - x1, 1.0)
    roi_h = jnp.maximum(y2 - y1, 1.0)
    bin_w = roi_w / out_size
    bin_h = roi_h / out_size
    grid = (jnp.arange(S, dtype=jnp.float32) + 0.5) / sr          # [S]
    ys = y1[:, None] + grid[None, :] * bin_h[:, None]             # [R, S]
    xs = x1[:, None] + grid[None, :] * bin_w[:, None]             # [R, S]

    def prep(coords, size):
        # maskrcnn_benchmark boundary handling: samples strictly outside
        # [-1, size] contribute zero; otherwise clamp into [0, size-1].
        valid = (coords >= -1.0) & (coords <= size)
        c = jnp.clip(coords, 0.0, size - 1.0)
        lo = jnp.clip(jnp.floor(c).astype(jnp.int32), 0, size - 1)
        hi = jnp.minimum(lo + 1, size - 1)
        frac = c - lo.astype(jnp.float32)
        return lo, hi, frac, valid.astype(jnp.float32)

    y_lo, y_hi, fy, vy = prep(ys, Hf)
    x_lo, x_hi, fx, vx = prep(xs, Wf)

    b3 = box_batch_idx.astype(jnp.int32)[:, None, None]           # [R, 1, 1]

    def gather(yi, xi):
        # 2x2-neighbourhood gather -> [R, S, S, C]
        return feats[b3, yi[:, :, None], xi[:, None, :]]

    w00 = ((1.0 - fy)[:, :, None] * (1.0 - fx)[:, None, :])[..., None]
    w01 = ((1.0 - fy)[:, :, None] * fx[:, None, :])[..., None]
    w10 = (fy[:, :, None] * (1.0 - fx)[:, None, :])[..., None]
    w11 = (fy[:, :, None] * fx[:, None, :])[..., None]
    valid = (vy[:, :, None] * vx[:, None, :])[..., None]

    samples = (w00 * gather(y_lo, x_lo) + w01 * gather(y_lo, x_hi)
               + w10 * gather(y_hi, x_lo) + w11 * gather(y_hi, x_hi)) * valid
    samples = samples.reshape(R, out_size, sr, out_size, sr, C).mean(axis=(2, 4))
    return jnp.transpose(samples, (0, 3, 1, 2))                   # [R, C, out, out]


# ----------------------------------------------------------------------------
# ROIRelationHead (eval-mode forward)
# ----------------------------------------------------------------------------
class ROIRelationHeadPallas:
    def __init__(self, in_channels, pooler_resolution=7, representation_size=32,
                 num_rel_classes=16, key=None):
        if key is None:
            key = jax.random.PRNGKey(0)
        k1, k2, k3 = jax.random.split(key, 3)
        P = pooler_resolution
        D = in_channels * P * P
        H = representation_size
        K = num_rel_classes
        self.pooler_resolution = P

        tune = _tpu_tuning()
        # Pad D up to a multiple of a large TK (few big reduction steps; the
        # zero pad region contributes nothing numerically).
        TK = min(tune["tk"], _round_up(D, 128))
        D_pad = _round_up(D, TK)
        Hp = _round_up(H, 128)
        Kp = _round_up(K, 128)
        self._tune = tune
        self._dims = dict(H=H, K=K, D_pad=D_pad, Hp=Hp, Kp=Kp, TK=TK)

        f32, bf16 = jnp.float32, jnp.bfloat16
        # deterministic synthetic init (Kaiming-ish scale)
        w6 = jax.random.normal(k1, (D, H), f32) * 0.02
        w7 = jax.random.normal(k2, (H, H), f32) * 0.05
        wp = jax.random.normal(k3, (H, K), f32) * 0.05
        b6 = jnp.zeros((1, H), f32)
        b7 = jnp.zeros((1, H), f32)
        bp = jnp.zeros((1, K), f32)

        # One-time pad + cast of the weights to the kernel's aligned layouts
        # (removes the per-forward pad/cast HBM traffic flagged in review).
        self._params = dict(
            w6=jnp.zeros((D_pad, Hp), bf16).at[:D, :H].set(w6.astype(bf16)),
            w7=jnp.zeros((Hp, Hp), bf16).at[:H, :H].set(w7.astype(bf16)),
            wp=jnp.zeros((Hp, Kp), bf16).at[:H, :K].set(wp.astype(bf16)),
            b6=jnp.zeros((1, Hp), f32).at[:, :H].set(b6),
            b7=jnp.zeros((1, Hp), f32).at[:, :H].set(b7),
            # padded class columns get a huge negative bias -> softmax ignores them
            bp=jnp.full((1, Kp), _NEG_INF, f32).at[:, :K].set(bp),
        )

    @functools.partial(jax.jit, static_argnums=(0,))
    def __call__(self, features, boxes, box_batch_idx):
        """Eval-mode forward mirroring the PyTorch module:
          x      : feature-extractor output [R, representation_size]
          result : post-processed relation class probabilities [R, K]
          losses : {} (eval mode)
        """
        # TODO(synk): training path (loss_evaluator.subsample + loss_relation)
        # and multi-level FPN box-to-level assignment are not implemented;
        # this is the eval-mode, single-level forward only.
        pooled = roi_align(features, boxes, box_batch_idx,
                           out_size=self.pooler_resolution)        # [R, C, P, P]
        R = pooled.shape[0]
        # flattened activations handed to the kernel already in bf16
        pooled_flat = pooled.reshape(R, -1).astype(jnp.bfloat16)   # [R, C*P*P]
        x, probs = relation_head_mlp(pooled_flat, self._params, self._dims,
                                     self._tune)
        return x, probs, {}


# ----------------------------------------------------------------------------
if __name__ == "__main__":
    key = jax.random.PRNGKey(0)
    kf, kb = jax.random.split(key)

    # small shapes: 2 images, 4 channels, 16x16 feature maps (image size 64x64
    # -> spatial_scale 0.25), 4 proposals per image => R = 8 ROIs.
    N, C, Hf, Wf = 2, 4, 16, 16
    features = jax.random.normal(kf, (N, C, Hf, Wf), jnp.float32)  # layout: NCHW

    # proposals: (x1, y1, x2, y2) in image coordinates (image is 64x64)
    boxes = jnp.array([
        [ 4.0,  4.0, 28.0, 28.0],
        [10.0,  8.0, 50.0, 40.0],
        [ 0.0,  0.0, 63.0, 63.0],
        [20.0, 30.0, 44.0, 60.0],
        [ 2.0, 12.0, 30.0, 34.0],
        [16.0, 16.0, 48.0, 48.0],
        [ 5.0, 40.0, 40.0, 62.0],
        [32.0,  2.0, 62.0, 30.0],
    ], dtype=jnp.float32)
    box_batch_idx = jnp.array([0, 0, 0, 0, 1, 1, 1, 1], dtype=jnp.int32)

    head = ROIRelationHeadPallas(in_channels=C, pooler_resolution=7,
                                 representation_size=32, num_rel_classes=16)

    x, result, losses = head(features, boxes, box_batch_idx)
    jax.block_until_ready(x)
    jax.block_until_ready(result)

    assert x.shape == (8, 32)
    assert result.shape == (8, 16)
    assert losses == {}
    assert bool(jnp.all(jnp.isfinite(x)))
    assert bool(jnp.all(jnp.isfinite(result)))
    # softmax rows sum to ~1 (exact division in the kernel epilogue)
    assert jnp.allclose(jnp.sum(result, axis=-1), 1.0, atol=1e-4)

    print("KERNEL_OK")
</pallas_src>

<mosaic_0001>
module attributes {stable_mosaic.version = 11 : i64} {
  func.func @relation_head_kernel(%arg0: i32, %arg1: i32, %arg2: memref<8x256xbf16, #tpu.memory_space<vmem>>, %arg3: memref<256x128xbf16, #tpu.memory_space<vmem>>, %arg4: memref<1x128xf32, #tpu.memory_space<vmem>>, %arg5: memref<128x128xbf16, #tpu.memory_space<vmem>>, %arg6: memref<1x128xf32, #tpu.memory_space<vmem>>, %arg7: memref<128x128xbf16, #tpu.memory_space<vmem>>, %arg8: memref<1x128xf32, #tpu.memory_space<vmem>>, %arg9: memref<8x128xf32, #tpu.memory_space<vmem>>, %arg10: memref<8x128xf32, #tpu.memory_space<vmem>>, %arg11: memref<8x128xf32, #tpu.memory_space<vmem>>) attributes {dimension_semantics = [#tpu.dimension_semantics<parallel>, #tpu.dimension_semantics<arbitrary>], iteration_bounds = array<i64: 1, 1>, scalar_prefetch = 0 : i64, scratch_operands = 1 : i64, tpu.core_type = #tpu.core_type<tc>, window_params = [{transform_indices = @transform_0, window_bounds = array<i64: 8, 256>}, {transform_indices = @transform_1, window_bounds = array<i64: 256, 128>}, {pipeline_mode = #tpu.pipeline_mode<synchronous>, transform_indices = @transform_2, window_bounds = array<i64: 1, 128>}, {pipeline_mode = #tpu.pipeline_mode<synchronous>, transform_indices = @transform_3, window_bounds = array<i64: 128, 128>}, {pipeline_mode = #tpu.pipeline_mode<synchronous>, transform_indices = @transform_4, window_bounds = array<i64: 1, 128>}, {pipeline_mode = #tpu.pipeline_mode<synchronous>, transform_indices = @transform_5, window_bounds = array<i64: 128, 128>}, {pipeline_mode = #tpu.pipeline_mode<synchronous>, transform_indices = @transform_6, window_bounds = array<i64: 1, 128>}, {transform_indices = @transform_7, window_bounds = array<i64: 8, 128>}, {transform_indices = @transform_8, window_bounds = array<i64: 8, 128>}]} {
    %c0_i32 = arith.constant 0 : i32
    %0 = arith.cmpi eq, %arg1, %c0_i32 : i32
    %1 = arith.extui %0 : i1 to i32
    %c0_i32_0 = arith.constant 0 : i32
    %2 = arith.cmpi ne, %1, %c0_i32_0 : i32
    scf.if %2 {
      %cst_10 = arith.constant 0.000000e+00 : f32
      %12 = vector.broadcast %cst_10 : f32 to vector<8x128xf32>
      %c0_11 = arith.constant 0 : index
      %c0_12 = arith.constant 0 : index
      %13 = vector.load %arg11[%c0_11, %c0_12] : memref<8x128xf32, #tpu.memory_space<vmem>>, vector<8x128xf32>
      tpu.vector_store %arg11[%c0_11, %c0_12], %12 {strides = array<i32>} : memref<8x128xf32, #tpu.memory_space<vmem>>, vector<8x128xf32>,
    } else {
    }
    %c0 = arith.constant 0 : index
    %c0_1 = arith.constant 0 : index
    %3 = vector.load %arg11[%c0, %c0_1] : memref<8x128xf32, #tpu.memory_space<vmem>>, vector<8x128xf32>
    %c0_2 = arith.constant 0 : index
    %c0_3 = arith.constant 0 : index
    %4 = vector.load %arg2[%c0_2, %c0_3] : memref<8x256xbf16, #tpu.memory_space<vmem>>, vector<8x256xbf16>
    %c0_4 = arith.constant 0 : index
    %c0_5 = arith.constant 0 : index
    %5 = vector.load %arg3[%c0_4, %c0_5] : memref<256x128xbf16, #tpu.memory_space<vmem>>, vector<256x128xbf16>
    %cst = arith.constant dense<0.000000e+00> : vector<8x128xf32>
    %6 = tpu.matmul %4, %5, %cst {dimension_numbers = #tpu.dot_dimension_numbers<[1], [0], [0], [1], [0, 0, 1, 1], [], []>} : vector<8x256xbf16>, vector<256x128xbf16>, vector<8x128xf32> -> vector<8x128xf32>
    %7 = arith.addf %3, %6 : vector<8x128xf32>
    %c0_6 = arith.constant 0 : index
    %c0_7 = arith.constant 0 : index
    %8 = vector.load %arg11[%c0_6, %c0_7] : memref<8x128xf32, #tpu.memory_space<vmem>>, vector<8x128xf32>
    tpu.vector_store %arg11[%c0_6, %c0_7], %7 {strides = array<i32>} : memref<8x128xf32, #tpu.memory_space<vmem>>, vector<8x128xf32>,
    %c0_i32_8 = arith.constant 0 : i32
    %9 = arith.cmpi eq, %arg1, %c0_i32_8 : i32
    %10 = arith.extui %9 : i1 to i32
    %c0_i32_9 = arith.constant 0 : i32
    %11 = arith.cmpi ne, %10, %c0_i32_9 : i32
    scf.if %11 {
      %c0_10 = arith.constant 0 : index
      %c0_11 = arith.constant 0 : index
      %12 = vector.load %arg11[%c0_10, %c0_11] : memref<8x128xf32, #tpu.memory_space<vmem>>, vector<8x128xf32>
      %c0_12 = arith.constant 0 : index
      %c0_13 = arith.constant 0 : index
      %13 = vector.load %arg4[%c0_12, %c0_13] : memref<1x128xf32, #tpu.memory_space<vmem>>, vector<1x128xf32>
      %14 = vector.broadcast %13 : vector<1x128xf32> to vector<8x128xf32>
      %15 = arith.addf %12, %14 : vector<8x128xf32>
      %cst_14 = arith.constant 0.000000e+00 : f32
      %16 = vector.broadcast %cst_14 : f32 to vector<8x128xf32>
      %17 = arith.maximumf %15, %16 : vector<8x128xf32>
      %18 = arith.truncf %17 : vector<8x128xf32> to vector<8x128xbf16>
      %c0_15 = arith.constant 0 : index
      %c0_16 = arith.constant 0 : index
      %19 = vector.load %arg5[%c0_15, %c0_16] : memref<128x128xbf16, #tpu.memory_space<vmem>>, vector<128x128xbf16>
      %cst_17 = arith.constant dense<0.000000e+00> : vector<8x128xf32>
      %20 = tpu.matmul %18, %19, %cst_17 {dimension_numbers = #tpu.dot_dimension_numbers<[1], [0], [0], [1], [0, 0, 1, 1], [], []>} : vector<8x128xbf16>, vector<128x128xbf16>, vector<8x128xf32> -> vector<8x128xf32>
      %c0_18 = arith.constant 0 : index
      %c0_19 = arith.constant 0 : index
      %21 = vector.load %arg6[%c0_18, %c0_19] : memref<1x128xf32, #tpu.memory_space<vmem>>, vector<1x128xf32>
      %22 = vector.broadcast %21 : vector<1x128xf32> to vector<8x128xf32>
      %23 = arith.addf %20, %22 : vector<8x128xf32>
      %cst_20 = arith.constant 0.000000e+00 : f32
      %24 = vector.broadcast %cst_20 : f32 to vector<8x128xf32>
      %25 = arith.maximumf %23, %24 : vector<8x128xf32>
      %c0_21 = arith.constant 0 : index
      %c0_22 = arith.constant 0 : index
      %26 = vector.load %arg9[%c0_21, %c0_22] : memref<8x128xf32, #tpu.memory_space<vmem>>, vector<8x128xf32>
      tpu.vector_store %arg9[%c0_21, %c0_22], %25 {strides = array<i32>} : memref<8x128xf32, #tpu.memory_space<vmem>>, vector<8x128xf32>,
      %27 = arith.truncf %25 : vector<8x128xf32> to vector<8x128xbf16>
      %c0_23 = arith.constant 0 : index
      %c0_24 = arith.constant 0 : index
      %28 = vector.load %arg7[%c0_23, %c0_24] : memref<128x128xbf16, #tpu.memory_space<vmem>>, vector<128x128xbf16>
      %cst_25 = arith.constant dense<0.000000e+00> : vector<8x128xf32>
      %29 = tpu.matmul %27, %28, %cst_25 {dimension_numbers = #tpu.dot_dimension_numbers<[1], [0], [0], [1], [0, 0, 1, 1], [], []>} : vector<8x128xbf16>, vector<128x128xbf16>, vector<8x128xf32> -> vector<8x128xf32>
      %c0_26 = arith.constant 0 : index
      %c0_27 = arith.constant 0 : index
      %30 = vector.load %arg8[%c0_26, %c0_27] : memref<1x128xf32, #tpu.memory_space<vmem>>, vector<1x128xf32>
      %31 = vector.broadcast %30 : vector<1x128xf32> to vector<8x128xf32>
      %32 = arith.addf %29, %31 : vector<8x128xf32>
      %cst_28 = arith.constant dense<0xFF800000> : vector<8xf32>
      %33 = vector.multi_reduction <maximumf>, %32, %cst_28 [1] : vector<8x128xf32> to vector<8xf32>
      %34 = vector.shape_cast %33 : vector<8xf32> to vector<8x1xf32>
      %35 = vector.broadcast %34 : vector<8x1xf32> to vector<8x128xf32>
      %36 = arith.subf %32, %35 : vector<8x128xf32>
      %37 = math.exp %36 : vector<8x128xf32>
      %cst_29 = arith.constant dense<0.000000e+00> : vector<8xf32>
      %38 = vector.multi_reduction <add>, %37, %cst_29 [1] : vector<8x128xf32> to vector<8xf32>
      %39 = vector.shape_cast %38 : vector<8xf32> to vector<8x1xf32>
      %40 = vector.broadcast %39 : vector<8x1xf32> to vector<8x128xf32>
      %41 = arith.divf %37, %40 : vector<8x128xf32>
      %c0_30 = arith.constant 0 : index
      %c0_31 = arith.constant 0 : index
      %42 = vector.load %arg10[%c0_30, %c0_31] : memref<8x128xf32, #tpu.memory_space<vmem>>, vector<8x128xf32>
      tpu.vector_store %arg10[%c0_30, %c0_31], %41 {strides = array<i32>} : memref<8x128xf32, #tpu.memory_space<vmem>>, vector<8x128xf32>,
    } else {
    }
    return
  }
  func.func @transform_0(%arg0: i32, %arg1: i32) -> (i32, i32) {
    %c0_i32 = arith.constant 0 : i32
    return %arg0, %arg1 : i32, i32
  }
  func.func @transform_1(%arg0: i32, %arg1: i32) -> (i32, i32) {
    %c0_i32 = arith.constant 0 : i32
    %c0_i32_0 = arith.constant 0 : i32
    return %arg1, %c0_i32 : i32, i32
  }
  func.func @transform_2(%arg0: i32, %arg1: i32) -> (i32, i32) {
    %c0_i32 = arith.constant 0 : i32
    %c0_i32_0 = arith.constant 0 : i32
    %c0_i32_1 = arith.constant 0 : i32
    return %c0_i32, %c0_i32_0 : i32, i32
  }
  func.func @transform_3(%arg0: i32, %arg1: i32) -> (i32, i32) {
    %c0_i32 = arith.constant 0 : i32
    %c0_i32_0 = arith.constant 0 : i32
    %c0_i32_1 = arith.constant 0 : i32
    return %c0_i32, %c0_i32_0 : i32, i32
  }
  func.func @transform_4(%arg0: i32, %arg1: i32) -> (i32, i32) {
    %c0_i32 = arith.constant 0 : i32
    %c0_i32_0 = arith.constant 0 : i32
    %c0_i32_1 = arith.constant 0 : i32
    return %c0_i32, %c0_i32_0 : i32, i32
  }
  func.func @transform_5(%arg0: i32, %arg1: i32) -> (i32, i32) {
    %c0_i32 = arith.constant 0 : i32
    %c0_i32_0 = arith.constant 0 : i32
    %c0_i32_1 = arith.constant 0 : i32
    return %c0_i32, %c0_i32_0 : i32, i32
  }
  func.func @transform_6(%arg0: i32, %arg1: i32) -> (i32, i32) {
    %c0_i32 = arith.constant 0 : i32
    %c0_i32_0 = arith.constant 0 : i32
    %c0_i32_1 = arith.constant 0 : i32
    return %c0_i32, %c0_i32_0 : i32, i32
  }
  func.func @transform_7(%arg0: i32, %arg1: i32) -> (i32, i32) {
    %c0_i32 = arith.constant 0 : i32
    %c0_i32_0 = arith.constant 0 : i32
    return %arg0, %c0_i32 : i32, i32
  }
  func.func @transform_8(%arg0: i32, %arg1: i32) -> (i32, i32) {
    %c0_i32 = arith.constant 0 : i32
    %c0_i32_0 = arith.constant 0 : i32
    return %arg0, %c0_i32 : i32, i32
  }
}

</mosaic_0001>

<bundles_post_ra>
// kernel: a_call__.1
= control target key start
LH: loop header
LB: loop body
LE: loop exit
PB: predicated region body
PF: predicated region fallthrough
CT: control target
= control target key end

     0   :  { %14 = vsyncpa [#allocation4], 0  ;;  %s813_s0 = inlined_call_operand.vmem [shape: bf16[8,256], index: 0, kind: input, shape index: {}]   ;;  %s814_s1 = inlined_call_operand.vmem [shape: bf16[256,128], index: 1, kind: input, shape index: {}]   ;;  %s815_s2 = inlined_call_operand.vmem [shape: f32[1,128], index: 2, kind: input, shape index: {}, may-alias: {2,4}]   ;;  %s816_s3 = inlined_call_operand.vmem [shape: bf16[128,128], index: 3, kind: input, shape index: {}]   ;;  %s817_s4 = inlined_call_operand.vmem [shape: f32[1,128], index: 4, kind: input, shape index: {}, may-alias: {2,4}]   ;;  %s818_s5 = inlined_call_operand.vmem [shape: bf16[128,128], index: 5, kind: input, shape index: {}]   ;;  %s819_s6 = inlined_call_operand.vmem [shape: f32[1,128], index: 6, kind: input, shape index: {}]   ;;  %s820_s7 = inlined_call_operand.hbm [shape: f32[8,128], index: 7, kind: output, shape index: {0}]   ;;  %s821_s8 = inlined_call_operand.hbm [shape: f32[8,128], index: 8, kind: output, shape index: {1}]  }
   0x1   :  { %v566_v0 = vld [vmem:[%s814_s1 + $0x38] sm:$0xff]  ;;  %v565_v2 = vld [vmem:[%s814_s1 + $0x30] sm:$0xff]  ;;  %v564_v5 = vld [vmem:[%s814_s1 + $0x28] sm:$0xff] }
   0x2   :  { %v574_v1 = vld [vmem:[%s814_s1 + $0x78] sm:$0xff]  ;;  %172 = vmatpush.bf16.msra.mxu0 %v566_v0  ;;  %v573_v3 = vld [vmem:[%s814_s1 + $0x70] sm:$0xff]  ;;  %v572_v6 = vld [vmem:[%s814_s1 + $0x68] sm:$0xff] }
   0x3   :  { %185 = vmatpush.bf16.msra.mxu1 %v574_v1  ;;  %v582_v4 = vld [vmem:[%s816_s3 + $0x38] sm:$0xff]  ;;  %v581_v7 = vld [vmem:[%s816_s3 + $0x30] sm:$0xff] }
   0x4   :  { %279 = vmatpush.bf16.msra.mxu2 %v582_v4 }
   0x6   :  { %173 = vmatpush.bf16.msra.mxu0 %v565_v2 }
   0x7   :  { %186 = vmatpush.bf16.msra.mxu1 %v573_v3 }
   0x8   :  { %15 = vsyncpa [#allocation6], 0  ;;  %v563_v8 = vld [vmem:[%s814_s1 + $0x20] sm:$0xff]  ;;  %280 = vmatpush.bf16.msra.mxu2 %v581_v7  ;;  %v580_v10 = vld [vmem:[%s816_s3 + $0x28] sm:$0xff]  ;;  %s652_s29 = smov [#allocation3]   ;;  %s417_s11 = sshll.u32 %s821_s8, 4  ;;  %s418_s11 = int_to_ptr.hbm [resolvable:$true] %s417_s11 }
   0x9   :  { %v571_v9 = vld [vmem:[%s814_s1 + $0x60] sm:$0xff]  ;;  %v562_v11 = vld [vmem:[%s814_s1 + $0x18] sm:$0xff]  ;;  %v561_v14 = vld [vmem:[%s814_s1 + $0x10] sm:$0xff]  ;;  %s404_s30 = sshll.u32 %s652_s29, 4  ;;  %s405_s30 = int_to_ptr.vmem [resolvable:$true] %s404_s30 }
   0xa   :  { %174 = vmatpush.bf16.msra.mxu0 %v564_v5  ;;  %v570_v12 = vld [vmem:[%s814_s1 + $0x58] sm:$0xff]  ;;  %v579_v13 = vld [vmem:[%s816_s3 + $0x20] sm:$0xff]  ;;  %v569_v15 = vld [vmem:[%s814_s1 + $0x50] sm:$0xff] }
   0xb   :  { %187 = vmatpush.bf16.msra.mxu1 %v572_v6  ;;  %v578_v16 = vld [vmem:[%s816_s3 + $0x18] sm:$0xff]  ;;  %v560_v17 = vld [vmem:[%s814_s1 + $0x8] sm:$0xff]  ;;  %v36_v19 = vld [vmem:[%s813_s0] sm:$0xff]  ;;  %s406_s0 = sshll.u32 %s820_s7, 4  ;;  %s407_s0 = int_to_ptr.hbm [resolvable:$true] %s406_s0 }
   0xc   :  { %281 = vmatpush.bf16.msra.mxu2 %v580_v10  ;;  %v568_v18 = vld [vmem:[%s814_s1 + $0x48] sm:$0xff]  ;;  %v577_v20 = vld [vmem:[%s816_s3 + $0x10] sm:$0xff]  ;;  %v70_v21 = vunpack.c.l.b16 %v36_v19  ;;  %v71_v22 = vunpack.c.h.b16 %v36_v19  ;;  %v559_v23 = vld [vmem:[%s814_s1] sm:$0xff] }
   0xd   :  { %v567_v24 = vld [vmem:[%s814_s1 + $0x40] sm:$0xff]  ;;  %v576_v27 = vld [vmem:[%s816_s3 + $0x8] sm:$0xff]  ;;  %v590_v29 = vld [vmem:[%s818_s5 + $0x38] sm:$0xff] }
   0xe   :  { %175 = vmatpush.bf16.msra.mxu0 %v563_v8  ;;  %v72_v25 = vpack.c.b16 %v70_v21, %v70_v21  ;;  %v73_v26 = vpack.c.b16 %v71_v22, %v71_v22  ;;  %v575_v28 = vld [vmem:[%s816_s3] sm:$0xff]  ;;  %363 = vmatpush.bf16.msra.mxu3 %v590_v29  ;;  %v589_v30 = vld [vmem:[%s818_s5 + $0x30] sm:$0xff]  ;;  %v588_v31 = vld [vmem:[%s818_s5 + $0x28] sm:$0xff] }
   0xf   :  { %188 = vmatpush.bf16.msra.mxu1 %v571_v9  ;;  %v587_v32 = vld [vmem:[%s818_s5 + $0x20] sm:$0xff]  ;;  %v586_v33 = vld [vmem:[%s818_s5 + $0x18] sm:$0xff]  ;;  %v585_v34 = vld [vmem:[%s818_s5 + $0x10] sm:$0xff] }
  0x10   :  { %282 = vmatpush.bf16.msra.mxu2 %v579_v13  ;;  %v593_v35 = vld [vmem:[%s815_s2] ss:$0 sm:$0xff]  ;;  %v584_v44 = vld [vmem:[%s818_s5 + $0x8] sm:$0xff] }
  0x11   :  { %v583_v45 = vld [vmem:[%s818_s5] sm:$0xff] }
  0x12   :  { %176 = vmatpush.bf16.msra.mxu0 %v562_v11  ;;  %364 = vmatpush.bf16.msra.mxu3 %v589_v30  ;;  %v594_v46 = vld [vmem:[%s817_s4] ss:$0 sm:$0xff] }
  0x13   :  { %189 = vmatpush.bf16.msra.mxu1 %v570_v12  ;;  %v595_v52 = vld [vmem:[%s819_s6] ss:$0 sm:$0xff]  ;;  %s653_s6 = smov [#allocation5]  }
  0x14   :  { %283 = vmatpush.bf16.msra.mxu2 %v578_v16  ;;  %s415_s7 = sshll.u32 %s653_s6, 4  ;;  %s416_s7 = int_to_ptr.vmem [resolvable:$true] %s415_s7 }
  0x16   :  { %177 = vmatpush.bf16.msra.mxu0 %v561_v14  ;;  %365 = vmatpush.bf16.msra.mxu3 %v588_v31 }
  0x17   :  { %190 = vmatpush.bf16.msra.mxu1 %v569_v15 }
  0x18   :  { %284 = vmatpush.bf16.msra.mxu2 %v577_v20 }
  0x1a   :  { %178 = vmatpush.bf16.msra.mxu0 %v560_v17  ;;  %366 = vmatpush.bf16.msra.mxu3 %v587_v32 }
  0x1b   :  { %191 = vmatpush.bf16.msra.mxu1 %v568_v18 }
  0x1c   :  { %285 = vmatpush.bf16.msra.mxu2 %v576_v27 }
  0x1e   :  { %179 = vmatpush.bf16.msra.mxu0 %v559_v23  ;;  %367 = vmatpush.bf16.msra.mxu3 %v586_v33 }
  0x1f   :  { %192 = vmatpush.bf16.msra.mxu1 %v567_v24 }
  0x20   :  { %286 = vmatpush.bf16.msra.mxu2 %v575_v28 }
  0x21   :  { %180 = vmatmul.bf16.vlgmr.msra.gmra.mxu0 %v72_v25 }
  0x22   :  { %193 = vmatmul.bf16.vlgmr.msra.gmra.mxu1 %v73_v26  ;;  %368 = vmatpush.bf16.msra.mxu3 %v585_v34 }
  0x26   :  { %369 = vmatpush.bf16.msra.mxu3 %v584_v44 }
  0x2a   :  { %370 = vmatpush.bf16.msra.mxu3 %v583_v45 }
  0x9e   :  { %v181_v36 = vpop.f32.mrf.mxu0 }
  0x9f   :  { %v194_v37 = vpop.f32.mrf.mxu1 }
  0xa0   :  { %v195_v38 = vadd.f32 %v194_v37, %v181_v36 }
  0xa2   :  { %v208_v39 = vadd.f32 %v593_v35, %v195_v38 }
  0xa4   :  { %v209_v40 = vmax.f32 %v208_v39, 0.0 }
  0xa6   :  { %v210_v41 = vpack.c.bf16 %v209_v40, %v209_v40  ;;  %v183_v42 = vpop.f32.mrf.mxu0 }
  0xa7   :  { %v196_v43 = vpop.f32.mrf.mxu1 }
  0xa8   :  { %287 = vmatmul.bf16.vlgmr.msra.gmra.mxu2 %v210_v41 }
 0x12b   :  { %v288_v47 = vpop.f32.mrf.mxu2 }
 0x12c   :  { %v289_v48 = vadd.f32 %v594_v46, %v288_v47 }
 0x12e   :  { %v292_v49 = vmax.f32 %v289_v48, 0.0 }
 0x130   :  { %293 = vst [vmem:[#allocation3] sm:$0xff] %v292_v49  ;;  %v294_v50 = vpack.c.bf16 %v292_v49, %v292_v49 }
 0x131   :  { %409 = dma.vmem_to_hbm [thread:$0]  %s405_s30, 128, %s407_s0, [#allocation4]  }
 0x132   :  { %371 = vmatmul.bf16.vlgmr.msra.gmra.mxu3 %v294_v50 }
 0x133   :  { %v290_v51 = vpop.f32.mrf.mxu2 }
 0x1b5   :  { %v372_v53 = vpop.f32.mrf.mxu3 }
 0x1b6   :  { %v373_v54 = vadd.f32 %v595_v52, %v372_v53 }
 0x1b8   :  { %376 = vmax.xlane.f32.xlu0 %v373_v54 }
 0x1bd   :  { %v374_v55 = vpop.f32.mrf.mxu3 }
 0x22b   :  { %v377_v56 = vpop.xlane.xlu0 %376 }
 0x22c   :  { %v378_v57 = vsub.f32 %v373_v54, %v377_v56 }
 0x22e   :  { %v379_v58 = vmul.f32 1.442695, %v378_v57 }
 0x230   :  { %596 = vpow2.f32 %v379_v58 }
 0x236   :  { %v597_v59 = vpop.eup %596 }
 0x237   :  { %381 = vadd.xlane.f32.xlu0 %v597_v59 }
 0x2aa   :  { %v382_v60 = vpop.xlane.xlu0 %381 }
 0x2ab   :  { %598 = vrcp.f32 %v382_v60  ;;  %v394_v0 = vand.u32 2147483648, %v382_v60  ;;  %v392_v2 = vand.u32 2147483647, %v382_v60  ;;  %vm388_vm1 = vweird.f32 %v382_v60 }
 0x2ad   :  { %v395_v4 = vor.u32 1.1754944e-38, %v394_v0  ;;  %vm393_vm3 = vcmp.eq.f32.partialorder %v392_v2, 8.507059e+37 }
 0x2b1   :  { %v599_v61 = vpop.eup %598 }
 0x2b2   :  { %v384_v62 = vmul.f32 %v599_v61, %v382_v60  ;;  %vm389_vm0 = vweird.f32 %v599_v61 }
 0x2b3   :  { %vm390_vm2 = vmor %vm388_vm1, %vm389_vm0 }
 0x2b4   :  { %v385_v63 = vsub.f32 1.0, %v384_v62 }
 0x2b6   :  { %v386_v1 = vmul.f32 %v599_v61, %v385_v63 }
 0x2b8   :  { %v387_v3 = vadd.f32 %v599_v61, %v386_v1 }
 0x2ba   :  { %v391_v5 = vsel %vm390_vm2, %v599_v61, %v387_v3 }
 0x2bb   :  { %v396_v6 = vsel %vm393_vm3, %v395_v4, %v391_v5 }
 0x2bc   :  { %v397_v7 = vmul.f32 %v597_v59, %v396_v6 }
 0x2be   :  { %398 = vst [vmem:[#allocation5] sm:$0xff] %v397_v7 }
 0x2bf   :  { %420 = dma.vmem_to_hbm [thread:$0]  %s416_s7, 128, %s418_s11, [#allocation6]  }
 0x2c0   :  { %648 = dma.done.wait [#allocation4], 128  }
 0x2c1   :  { %649 = vsyncadd [#allocation4], 4294967168 }
 0x2c2   :  { %650 = dma.done.wait [#allocation6], 128  }
 0x2c3   :  { %651 = vsyncadd [#allocation6], 4294967168 }
 0x2c4   :  { %429 = vsyncpa [#allocation4], 1 }
 0x2c5   :  { %430 = vsyncpa [#allocation6], 1 }

</bundles_post_ra>
